<compile_context>
chip_gen: v6e
topology: v6e:2x2x1
jax: 0.10.0
libtpu: 0.0.40
codegen_flags: <defaults>
</compile_context>

<pallas_src>
import jax
import jax.numpy as jnp
from jax import lax
from jax.experimental import pallas as pl
from jax.experimental.pallas import tpu as pltpu


def _round_up(x, m):
    return (x + m - 1) // m * m


def _vmem_capacity_bytes():
    """Physical per-core VMEM capacity (conservative default if unqueryable)."""
    try:
        return int(pltpu.get_tpu_info().vmem_capacity_bytes)
    except Exception:
        return 64 << 20          # conservative default: v7x per-TC VMEM


def _make_kernel(tm, n_rows, num_groups, acc_in_out):
    def kernel(grp_ref, ind_ref, repr_hbm, out_ref, *scratch):
        if acc_in_out:
            repr_vmem, copy_sem = scratch
            acc_ref = out_ref                      # f32 output doubles as accumulator
        else:
            repr_vmem, acc_ref, copy_sem = scratch

        mi = pl.program_id(0)

        @pl.when(mi == 0)
        def _():
            # Kick off the one-time HBM->VMEM copy of the representation
            # table; it is waited on below, AFTER the repr-independent
            # one-hot builds, so the DMA overlaps useful work.
            pltpu.make_async_copy(repr_hbm, repr_vmem, copy_sem).start()
            acc_ref[...] = jnp.zeros_like(acc_ref)

        dt = repr_vmem.dtype
        ind_col = ind_ref[0]                       # (TM, 1) int32
        grp_row = grp_ref[0]                       # (1, TM) int32

        # Gather one-hot: onehot_ind[r, n] = (ind[r] == n).
        n_iota = lax.broadcasted_iota(jnp.int32, (tm, n_rows), 1)
        onehot_ind = (n_iota == ind_col).astype(dt)
        # Scatter one-hot: onehot_grp[g, r] = (grp[r] == g).
        # Padded tail rows carry grp == -1 -> all-zero column -> no contribution.
        g_iota = lax.broadcasted_iota(jnp.int32, (num_groups, tm), 0)
        onehot_grp = (g_iota == grp_row).astype(dt)

        @pl.when(mi == 0)
        def _():
            pltpu.make_async_copy(repr_hbm, repr_vmem, copy_sem).wait()

        # gathered[r, :] = repr[ind[r], :]   (MXU one-hot row select)
        gathered = jnp.dot(onehot_ind, repr_vmem[...],
                           preferred_element_type=jnp.float32)
        # Segment scatter-sum (MXU), accumulated in f32.
        acc_ref[...] += jnp.dot(onehot_grp, gathered.astype(dt),
                                preferred_element_type=jnp.float32
                                ).astype(acc_ref.dtype)

        if not acc_in_out:
            @pl.when(mi == pl.num_programs(0) - 1)
            def _():
                out_ref[...] = acc_ref[...].astype(out_ref.dtype)

    return kernel


def _xla_scatter_sum(repr_, ind, grp, num_groups):
    # Fallback for tables that do not fit the single-core VMEM residency budget.
    # TODO(synk): chunked manual-DMA gather Pallas path instead of XLA fallback.
    gathered = jnp.take(repr_, ind, axis=0)
    return jax.ops.segment_sum(gathered, grp, num_segments=num_groups)


def scatter_repr_transform(repr_, ind, ind_block, scatter_method="sum",
                           chunk_rows=512):
    """Pallas implementation of ScatterReprTransform.forward.

    repr_:     [N, D] float embeddings
    ind:       [M]    int row indices into repr_
    ind_block: [G]    int per-group counts (invariant: sum(ind_block) == M)
    returns:   [G, D] per-group summed representations
    """
    assert scatter_method == "sum"   # TODO(synk): 'mean'/'max' not implemented
    N, D = repr_.shape
    M = int(ind.shape[0])
    G = int(ind_block.shape[0])
    out_dtype = repr_.dtype
    isz = jnp.dtype(out_dtype).itemsize

    if M == 0 or G == 0:
        return jnp.zeros((G, D), out_dtype)

    counts = ind_block.astype(jnp.int32)
    # Invariant check (only when ind_block is concrete; silently skipped under jit).
    try:
        csum = int(counts.sum())
    except Exception:
        csum = None
    if csum is not None and csum != M:
        raise ValueError(f"sum(ind_block)={csum} must equal len(ind)={M}")

    # count_to_group_index: counts [c0, c1, ...] -> [0]*c0 + [1]*c1 + ...
    grp = jnp.repeat(jnp.arange(G, dtype=jnp.int32), counts,
                     total_repeat_length=M)
    ind = ind.astype(jnp.int32)

    # ---- chunking: each grid step handles TM gathered rows ----
    TM = chunk_rows if M >= chunk_rows else _round_up(M, 8)
    M_pad = _round_up(M, TM)
    num_chunks = M_pad // TM

    acc_in_out = jnp.dtype(out_dtype) == jnp.dtype(jnp.float32)

    # ---- explicit VMEM accounting (capacity minus known consumers) ----
    cap = _vmem_capacity_bytes()
    repr_bytes = N * D * isz
    overhead = (2 * G * D * isz                       # pipelined out block (x2, conservative)
                + (0 if acc_in_out else G * D * 4)    # separate f32 accumulator
                + 2 * TM * 1024                       # grp + ind per-chunk blocks (tiled layout)
                + TM * N * isz                        # gather one-hot intermediate
                + G * TM * isz                        # scatter one-hot intermediate
                + TM * D * 4                          # gathered f32 intermediate
                + (4 << 20))                          # Mosaic internal scratch / slack
    budget = cap - overhead

    if repr_bytes > budget or N > 8192:
        # Resident-table / one-hot-gather path not profitable or not possible.
        return _xla_scatter_sum(repr_, ind, grp, G)

    # ---- padded per-chunk index blocks (small VMEM blocks, pipelined) ----
    grp_p = jnp.pad(grp, (0, M_pad - M), constant_values=-1)   # -1 -> no group
    ind_p = jnp.pad(ind, (0, M_pad - M))                       # row 0, zeroed by grp=-1
    grp3 = grp_p.reshape(num_chunks, 1, TM)                    # (1, TM) row per chunk
    ind3 = ind_p.reshape(num_chunks, TM, 1)                    # (TM, 1) col per chunk

    scratch = [pltpu.VMEM((N, D), out_dtype)]                  # resident repr table
    if not acc_in_out:
        scratch.append(pltpu.VMEM((G, D), jnp.float32))        # f32 accumulator
    scratch.append(pltpu.SemaphoreType.DMA)                    # table-copy semaphore

    vmem_limit = int(min(cap, max(repr_bytes + overhead + (4 << 20), 32 << 20)))

    cost = pl.CostEstimate(
        flops=2 * M_pad * D * (N + G),
        transcendentals=0,
        bytes_accessed=repr_bytes + 2 * M_pad * 4 + G * D * isz)

    grid_spec = pltpu.PrefetchScalarGridSpec(
        num_scalar_prefetch=0,
        grid=(num_chunks,),
        in_specs=[
            pl.BlockSpec((1, 1, TM), lambda i: (i, 0, 0)),     # per-chunk group ids
            pl.BlockSpec((1, TM, 1), lambda i: (i, 0, 0)),     # per-chunk gather ids
            pl.BlockSpec(memory_space=pl.ANY),                 # repr stays in HBM
        ],
        out_specs=pl.BlockSpec((G, D), lambda i: (0, 0)),
        scratch_shapes=scratch,
    )

    out = pl.pallas_call(
        _make_kernel(TM, N, G, acc_in_out),
        out_shape=jax.ShapeDtypeStruct((G, D), out_dtype),
        grid_spec=grid_spec,
        compiler_params=pltpu.CompilerParams(
            dimension_semantics=("arbitrary",),    # accumulator carried across chunks
            vmem_limit_bytes=vmem_limit),
        cost_estimate=cost,
    )(grp3, ind3, repr_)
    return out


def _reference(repr_, ind, ind_block):
    M = ind.shape[0]
    G = ind_block.shape[0]
    grp = jnp.repeat(jnp.arange(G), ind_block, total_repeat_length=M)
    return jax.ops.segment_sum(repr_[ind], grp, num_segments=G)


if __name__ == "__main__":
    key = jax.random.PRNGKey(0)

    # --- small test matching the module's intended shapes ---
    N, D = 16, 32                 # number of source representations, emb_dim
    counts = jnp.array([3, 1, 2, 2], dtype=jnp.int32)   # ind_block, G = 4 groups
    G = int(counts.shape[0])
    M = int(counts.sum())         # = 8 gathered rows

    k1, k2, k3, k4, k5 = jax.random.split(key, 5)
    repr_ = jax.random.normal(k1, (N, D), dtype=jnp.float32)
    ind = jax.random.randint(k2, (M,), 0, N, dtype=jnp.int32)

    out = scatter_repr_transform(repr_, ind, counts, scatter_method="sum")
    out = jax.block_until_ready(out)
    ref = _reference(repr_, ind, counts)
    assert out.shape == (G, D), out.shape
    assert jnp.allclose(out, ref, atol=1e-5, rtol=1e-5), "mismatch vs reference (small)"

    # --- multi-chunk test: exercises padding + accumulation across chunks ---
    N2, D2, G2 = 256, 64, 37
    counts2 = jax.random.randint(k3, (G2,), 0, 40, dtype=jnp.int32)  # may contain zeros
    M2 = int(counts2.sum())
    repr2 = jax.random.normal(k4, (N2, D2), dtype=jnp.float32)
    ind2 = jax.random.randint(k5, (M2,), 0, N2, dtype=jnp.int32)

    out2 = scatter_repr_transform(repr2, ind2, counts2, scatter_method="sum")
    out2 = jax.block_until_ready(out2)
    ref2 = _reference(repr2, ind2, counts2)
    assert out2.shape == (G2, D2), out2.shape
    assert jnp.allclose(out2, ref2, atol=1e-4, rtol=1e-4), "mismatch vs reference (multi-chunk)"

    print("KERNEL_OK")
</pallas_src>

<mosaic_0001>
module attributes {stable_mosaic.version = 11 : i64} {
  func.func @kernel(%arg0: i32, %arg1: memref<1x1x8xi32, #tpu.memory_space<vmem>>, %arg2: memref<1x8x1xi32, #tpu.memory_space<vmem>>, %arg3: memref<16x32xf32, #tpu.memory_space<any>>, %arg4: memref<4x32xf32, #tpu.memory_space<vmem>>, %arg5: memref<16x32xf32, #tpu.memory_space<vmem>>, %arg6: memref<!tpu.dma_semaphore, #tpu.memory_space<semaphore_mem>>) attributes {dimension_semantics = [#tpu.dimension_semantics<arbitrary>], iteration_bounds = array<i64: 1>, scalar_prefetch = 0 : i64, scratch_operands = 2 : i64, tpu.core_type = #tpu.core_type<tc>, window_params = [{transform_indices = @transform_0, window_bounds = array<i64: 1, 1, 8>}, {transform_indices = @transform_1, window_bounds = array<i64: 1, 8, 1>}, {}, {pipeline_mode = #tpu.pipeline_mode<synchronous>, transform_indices = @transform_3, window_bounds = array<i64: 4, 32>}]} {
    %c0_i32 = arith.constant 0 : i32
    %0 = arith.cmpi eq, %arg0, %c0_i32 : i32
    %1 = arith.extui %0 : i1 to i32
    %c0_i32_0 = arith.constant 0 : i32
    %2 = arith.cmpi ne, %1, %c0_i32_0 : i32
    scf.if %2 {
      tpu.enqueue_dma source(%arg3 : memref<16x32xf32, #tpu.memory_space<any>>) target(%arg5 : memref<16x32xf32, #tpu.memory_space<vmem>>) target_semaphore(%arg6 : memref<!tpu.dma_semaphore, #tpu.memory_space<semaphore_mem>>)
      %cst_15 = arith.constant 0.000000e+00 : f32
      %26 = vector.broadcast %cst_15 : f32 to vector<4x32xf32>
      %c0_16 = arith.constant 0 : index
      %c0_17 = arith.constant 0 : index
      %27 = vector.load %arg4[%c0_16, %c0_17] : memref<4x32xf32, #tpu.memory_space<vmem>>, vector<4x32xf32>
      tpu.vector_store %arg4[%c0_16, %c0_17], %26 {strides = array<i32>} : memref<4x32xf32, #tpu.memory_space<vmem>>, vector<4x32xf32>,
    } else {
    }
    %c0 = arith.constant 0 : index
    %c0_1 = arith.constant 0 : index
    %c0_2 = arith.constant 0 : index
    %3 = vector.load %arg2[%c0, %c0_1, %c0_2] : memref<1x8x1xi32, #tpu.memory_space<vmem>>, vector<1x8x1xi32>
    %4 = vector.shape_cast %3 : vector<1x8x1xi32> to vector<8x1xi32>
    %c0_3 = arith.constant 0 : index
    %c0_4 = arith.constant 0 : index
    %c0_5 = arith.constant 0 : index
    %5 = vector.load %arg1[%c0_3, %c0_4, %c0_5] : memref<1x1x8xi32, #tpu.memory_space<vmem>>, vector<1x1x8xi32>
    %6 = vector.shape_cast %5 : vector<1x1x8xi32> to vector<1x8xi32>
    %7 = tpu.iota {dimensions = array<i32: 1>} : vector<8x16xi32>
    %8 = vector.broadcast %4 : vector<8x1xi32> to vector<8x16xi32>
    %9 = arith.cmpi eq, %7, %8 : vector<8x16xi32>
    %10 = arith.extui %9 : vector<8x16xi1> to vector<8x16xi32>
    %11 = arith.sitofp %10 : vector<8x16xi32> to vector<8x16xf32>
    %12 = tpu.iota {dimensions = array<i32: 0>} : vector<4x8xi32>
    %13 = vector.broadcast %6 : vector<1x8xi32> to vector<4x8xi32>
    %14 = arith.cmpi eq, %12, %13 : vector<4x8xi32>
    %15 = arith.extui %14 : vector<4x8xi1> to vector<4x8xi32>
    %16 = arith.sitofp %15 : vector<4x8xi32> to vector<4x8xf32>
    %c0_i32_6 = arith.constant 0 : i32
    %17 = arith.cmpi eq, %arg0, %c0_i32_6 : i32
    %18 = arith.extui %17 : i1 to i32
    %c0_i32_7 = arith.constant 0 : i32
    %19 = arith.cmpi ne, %18, %c0_i32_7 : i32
    scf.if %19 {
      tpu.wait_dma2 semaphore(%arg6 : memref<!tpu.dma_semaphore, #tpu.memory_space<semaphore_mem>>) src(%arg3 : memref<16x32xf32, #tpu.memory_space<any>>) dst(%arg5 : memref<16x32xf32, #tpu.memory_space<vmem>>)
    } else {
    }
    %c0_8 = arith.constant 0 : index
    %c0_9 = arith.constant 0 : index
    %20 = vector.load %arg5[%c0_8, %c0_9] : memref<16x32xf32, #tpu.memory_space<vmem>>, vector<16x32xf32>
    %cst = arith.constant dense<0.000000e+00> : vector<8x32xf32>
    %21 = tpu.matmul %11, %20, %cst {dimension_numbers = #tpu.dot_dimension_numbers<[1], [0], [0], [1], [0, 0, 1, 1], [], []>} : vector<8x16xf32>, vector<16x32xf32>, vector<8x32xf32> -> vector<8x32xf32>
    %c0_10 = arith.constant 0 : index
    %c0_11 = arith.constant 0 : index
    %22 = vector.load %arg4[%c0_10, %c0_11] : memref<4x32xf32, #tpu.memory_space<vmem>>, vector<4x32xf32>
    %cst_12 = arith.constant dense<0.000000e+00> : vector<4x32xf32>
    %23 = tpu.matmul %16, %21, %cst_12 {dimension_numbers = #tpu.dot_dimension_numbers<[1], [0], [0], [1], [0, 0, 1, 1], [], []>} : vector<4x8xf32>, vector<8x32xf32>, vector<4x32xf32> -> vector<4x32xf32>
    %24 = arith.addf %22, %23 : vector<4x32xf32>
    %c0_13 = arith.constant 0 : index
    %c0_14 = arith.constant 0 : index
    %25 = vector.load %arg4[%c0_13, %c0_14] : memref<4x32xf32, #tpu.memory_space<vmem>>, vector<4x32xf32>
    tpu.vector_store %arg4[%c0_13, %c0_14], %24 {strides = array<i32>} : memref<4x32xf32, #tpu.memory_space<vmem>>, vector<4x32xf32>,
    return
  }
  func.func @transform_0(%arg0: i32) -> (i32, i32, i32) {
    %c0_i32 = arith.constant 0 : i32
    %c0_i32_0 = arith.constant 0 : i32
    %c0_i32_1 = arith.constant 0 : i32
    return %arg0, %c0_i32, %c0_i32_0 : i32, i32, i32
  }
  func.func @transform_1(%arg0: i32) -> (i32, i32, i32) {
    %c0_i32 = arith.constant 0 : i32
    %c0_i32_0 = arith.constant 0 : i32
    %c0_i32_1 = arith.constant 0 : i32
    return %arg0, %c0_i32, %c0_i32_0 : i32, i32, i32
  }
  func.func @transform_3(%arg0: i32) -> (i32, i32) {
    %c0_i32 = arith.constant 0 : i32
    %c0_i32_0 = arith.constant 0 : i32
    %c0_i32_1 = arith.constant 0 : i32
    return %c0_i32, %c0_i32_0 : i32, i32
  }
}

</mosaic_0001>

<bundles_post_ra>
// kernel: tpu_custom_call.1
= control target key start
LH: loop header
LB: loop body
LE: loop exit
PB: predicated region body
PF: predicated region fallthrough
CT: control target
= control target key end

     0   :  { %v32_v1 = vlaneseq  ;;  %vm28_vm0 = vcmask 257024   ;;  %v302_v2 = vmov 0   ;;  %v303_v4 = vmov 0.0   ;;  %s341_s0 = inlined_call_operand.vmem [shape: s32[1,1,8], index: 0, kind: input, shape index: {}]   ;;  %s342_s1 = inlined_call_operand.vmem [shape: s32[1,8,1], index: 1, kind: input, shape index: {}]   ;;  %s343_s2 = inlined_call_operand.hbm [shape: f32[16,32], index: 2, kind: input, shape index: {}]   ;;  %s344_s3 = inlined_call_operand.hbm [shape: f32[4,32], index: 3, kind: output, shape index: {}]  }
   0x1   :  { %v30_v0 = vld [vmem:[%s342_s1] sm:$0xff]  ;;  %257 = vset.pattern.permute.xlu0 %v302_v2  ;;  %29 = vst.msk [vmem:[#allocation4] sm:$0xf] %vm28_vm0, %v303_v4 }
   0x2   :  { %v230_v3 = vld [vmem:[%s341_s0] ss:$0 sm:$0xff] }
   0x3   :  { %8 = vsyncpa [#allocation5], 0  ;;  %35 = vperm.xlu0 %257, %v30_v0   ;;  %v41_v5 = vshrl.u32 %v32_v1, 7  ;;  %s304_s16 = smov [#allocation2]  }
   0x4   :  { %s24_s17 = sshll.u32 %s304_s16, 4  ;;  %s25_s17 = int_to_ptr.vmem [resolvable:$true] %s24_s17 }
   0x5   :  { %vm46_vm1 = vcmp.eq.s32.totalorder %v41_v5, %v230_v3  ;;  %s266_s18 = scalar_lea.vmem %s25_s17, 256  ;;  %p271_p1 = scmp.lt.s32.totalorder %s25_s17, %s25_s17 }
   0x6   :  { %p267_p0 = scmp.ne.s32.totalorder %s25_s17, %s266_s18  ;;  %p272_p2 = scmp.lt.s32.totalorder %s266_s18, %s266_s18 }
   0x8   :  { %p273_p3 = por %p272_p2, %p271_p1 }
   0xa   :  { %p274_p4 = pnand %p273_p3, %p267_p0 }
   0xc   :  { %277 = shalt.err (!%p274_p4)  }
   0xd   :  { %27 = dma.hbm_to_vmem [thread:$0]  %s343_s2, 256, %s25_s17, [#allocation3]  ;;  %v231_v6 = vsel %vm46_vm1, 1.0, %v303_v4  ;;  %v33_v7 = vand.u32 127, %v32_v1 }
  0x7e   :  { %v36_v8 = vpop.permute.xlu0 %35 }
  0x7f   :  { %vm37_vm2 = vcmp.eq.s32.totalorder %v33_v7, %v36_v8 }
  0x80   :  { %v229_v9 = vsel %vm37_vm2, 1.0, %v303_v4 }
  0x81   :  { %298 = dma.done.wait [#allocation3], 256 }
  0x82   :  { %299 = vsyncadd [#allocation3], 4294967040  ;;  %240 = vmatprep.subr.mxu0 %v303_v4  ;;  %247 = vmatprep.subr.mxu1 %v303_v4  ;;  %vm305_vm3 = vmmov 0   ;;  %v56_v10 = vld [vmem:[#allocation2 + $0x8] sm:$0xff]  ;;  %v55_v11 = vld [vmem:[#allocation2] sm:$0xff]  ;;  %vm57_vm4 = vcmask 130048  }
  0x83   :  { %244 = vmatprep.mubr.msk.f32.mxu0 %vm305_vm3, %v303_v4  ;;  %249 = vmatprep.mubr.msk.f32.mxu1 %vm305_vm3, %v303_v4  ;;  %vm132_vm5 = vcmask 64512   ;;  %v131_v14 = vld [vmem:[#allocation4] sm:$0xf]  ;;  %s306_s0 = smov [#allocation4]  }
  0x84   :  { %241 = vmatpush3.msra.mxu0 %v56_v10  ;;  %s215_s2 = sshll.u32 %s306_s0, 4  ;;  %s216_s2 = int_to_ptr.vmem [resolvable:$true] %s215_s2 }
  0x85   :  { %242 = vmatprep.subr.mxu0 %v303_v4  ;;  %s278_s20 = scalar_lea.vmem %s216_s2, 64  ;;  %p283_p6 = scmp.lt.s32.totalorder %s216_s2, %s216_s2 }
  0x86   :  { %243 = vmatpush3.msra.mxu0 %v55_v11  ;;  %p279_p5 = scmp.ne.s32.totalorder %s216_s2, %s278_s20  ;;  %p284_p7 = scmp.lt.s32.totalorder %s278_s20, %s278_s20 }
  0x87   :  { %245 = vmatmul.mubr.msk.f32.vlgmr.msra.gmra.mxu0 %vm57_vm4, %v229_v9 }
  0x88   :  { %p285_p8 = por %p284_p7, %p283_p6 }
  0x8a   :  { %p286_p9 = pnand %p285_p8, %p279_p5 }
 0x147   :  { %v127_v12 = vpop.f32.mrf.mxu0 }
 0x148   :  { %248 = vmatpush3.msra.mxu1 %v127_v12 }
 0x149   :  { %v246_v13 = vpop.f32.mrf.mxu0  ;;  %250 = vmatmul.mubr.msk.f32.vlgmr.msra.gmra.mxu1 %vm132_vm5, %v231_v6 }
 0x209   :  { %v202_v15 = vpop.f32.mrf.mxu1 }
 0x20a   :  { %v206_v16 = vadd.f32 %v202_v15, %v131_v14 }
 0x20b   :  { %v251_v17 = vpop.f32.mrf.mxu1 }
 0x20c   :  { %208 = vst.msk [vmem:[#allocation4] sm:$0xf] %vm28_vm0, %v206_v16 }
 0x20d   :  { %289 = shalt.err (!%p286_p9)
}
 0x20e   :  { %218 = dma.vmem_to_hbm [thread:$0]  %s216_s2, 64, %s344_s3, [#allocation5]  }
 0x20f   :  { %300 = dma.done.wait [#allocation5], 64  }
 0x210   :  { %301 = vsyncadd [#allocation5], 4294967232 }
 0x211   :  { %222 = vsyncpa [#allocation5], 1 }
 0x212   :  { %223 = vsyncmov [#allocation3] }
 0x215   :  { %s224_s23 = vpop.sfrf %223 }
 0x216   :  { %p234_p10 = scmp.ne.s32.totalorder %s224_s23, 0 }
 0x218   :  { %228 = shalt.err (%p234_p10)  }

</bundles_post_ra>
